<compile_context>
chip_gen: v7x
topology: tpu7x:2x2x1
jax: 0.10.0
libtpu: 0.0.40
codegen_flags: <defaults>
</compile_context>

<pallas_src>
import functools

import numpy as np

import jax
import jax.numpy as jnp
from jax.experimental import pallas as pl
from jax.experimental.pallas import tpu as pltpu


_LAYERS = ("conv1F", "conv1B", "conv2F", "conv2B",
           "conv3F", "conv3B", "conv4F", "conv4B")

_SEG_ORDER = ("FP1", "FP2", "FP3", "FP4",
              "FE0", "FE1", "FE2", "FE3",
              "BP0", "BP1", "BP2", "BP3",
              "BE1", "BE2", "BE3", "BE4")


def _round_up(v, m):
    return -(-v // m) * m


# ----------------------------------------------------------------------------
# Host-side builders: dense flattened-image operators for the 4x4/s2/p1 convs.
# ----------------------------------------------------------------------------
def conv_s2_matrix(w, h, wd):
    """Conv2d(1,1,k=4,s=2,p=1) as a dense (h*wd, (h//2)*(wd//2)) matrix."""
    ho, wo = h // 2, wd // 2
    w = np.asarray(w, np.float32).reshape(4, 4)
    m = np.zeros((h * wd, ho * wo), np.float32)
    for i in range(ho):
        for j in range(wo):
            for kh in range(4):
                for kw in range(4):
                    r, c = 2 * i + kh - 1, 2 * j + kw - 1
                    if 0 <= r < h and 0 <= c < wd:
                        m[r * wd + c, i * wo + j] += w[kh, kw]
    return m


def convT_s2_matrix(w, h, wd):
    """ConvTranspose2d(1,1,k=4,s=2,p=1) as a dense (h*wd, (2h)*(2wd)) matrix."""
    ho, wo = 2 * h, 2 * wd
    w = np.asarray(w, np.float32).reshape(4, 4)
    m = np.zeros((h * wd, ho * wo), np.float32)
    for i in range(h):
        for j in range(wd):
            for kh in range(4):
                for kw in range(4):
                    oi, oj = 2 * i + kh - 1, 2 * j + kw - 1
                    if 0 <= oi < ho and 0 <= oj < wo:
                        m[i * wd + j, oi * wo + oj] += w[kh, kw]
    return m


def make_params():
    """Deterministic parameters exactly as in the torch module __init__."""
    w = jnp.full((4, 4), 0.35, dtype=jnp.float32)   # (ones(4,4)*0.35).view(1,1,4,4)
    b = jnp.ones((1,), dtype=jnp.float32)
    return {name: (w, b) for name in _LAYERS}


def _build_layout(d0, d1, d2):
    """Packed-slab layout: each segment starts on a 128-lane boundary."""
    width = {"FP1": d1, "FP2": d2, "FP3": d1, "FP4": d0,
             "FE0": d0, "FE1": d1, "FE2": d2, "FE3": d1,
             "BP0": d0, "BP1": d1, "BP2": d2, "BP3": d1,
             "BE1": d1, "BE2": d2, "BE3": d1, "BE4": d0}
    layout, off = {}, 0
    for name in _SEG_ORDER:
        layout[name] = (off, width[name])
        off += _round_up(width[name], 128)
    return layout, off


# ----------------------------------------------------------------------------
# The fused kernel: 10 matmuls (merged shared-LHS), bias folded as constants,
# all 16 activations written into a single lane-dense output slab.
# ----------------------------------------------------------------------------
def _ubal_kernel(x_ref, y_ref, m1f_ref, m4b_ref, wa_ref, wb_ref, wc_ref,
                 out_ref, *, bias, layout, dims):
    d0, d1, d2 = dims
    relu = lambda v: jnp.maximum(v, 0.0)

    def mm(lhs, m_ref):
        return jnp.dot(lhs, m_ref[...], preferred_element_type=jnp.float32)

    def store(name, val):
        off, wdt = layout[name]
        out_ref[:, off:off + wdt] = val

    # Deterministic content for the (never-read) 128-lane padding slots.
    out_ref[...] = jnp.zeros_like(out_ref)

    x = x_ref[...]
    y = y_ref[...]

    # ---- forward (F) chain: depends only on input_x -------------------------
    fp1 = relu(mm(x, m1f_ref) + bias["1F"]);            store("FP1", fp1)
    t = mm(fp1, wa_ref)                                  # [conv1B | conv2F]
    store("FE0", relu(t[:, :d0] + bias["1B"]))
    fp2 = relu(t[:, d0:d0 + d2] + bias["2F"]);          store("FP2", fp2)
    t = mm(fp2, wb_ref)                                  # [conv2B | conv3F]
    store("FE1", relu(t[:, :d1] + bias["2B"]))
    fp3 = relu(t[:, d1:2 * d1] + bias["3F"]);           store("FP3", fp3)
    t = mm(fp3, wc_ref)                                  # [conv4F | conv3B]
    fp4 = jax.nn.sigmoid(t[:, :d0] + bias["4F"]);       store("FP4", fp4)
    store("FE2", relu(t[:, d0:d0 + d2] + bias["3B"]))
    store("FE3", relu(mm(fp4, m4b_ref) + bias["4B"]))

    # ---- backward (B) chain: depends only on input_y ------------------------
    bp3 = relu(mm(y, m4b_ref) + bias["4B"]);            store("BP3", bp3)
    t = mm(bp3, wc_ref)                                  # [conv4F | conv3B]
    store("BE4", relu(t[:, :d0] + bias["4F"]))
    bp2 = relu(t[:, d0:d0 + d2] + bias["3B"]);          store("BP2", bp2)
    t = mm(bp2, wb_ref)                                  # [conv2B | conv3F]
    bp1 = relu(t[:, :d1] + bias["2B"]);                 store("BP1", bp1)
    store("BE3", relu(t[:, d1:2 * d1] + bias["3F"]))
    t = mm(bp1, wa_ref)                                  # [conv1B | conv2F]
    bp0 = jax.nn.sigmoid(t[:, :d0] + bias["1B"]);       store("BP0", bp0)
    store("BE2", relu(t[:, d0:d0 + d2] + bias["2F"]))
    store("BE1", relu(mm(bp0, m1f_ref) + bias["1F"]))

    # TODO(synk): torch NaN guard (print + sys.exit) is host-side control flow; omitted.


# ----------------------------------------------------------------------------
# Factory: builds dense operators ONCE and returns a jitted forward callable.
# ----------------------------------------------------------------------------
def make_ubal_forward(params, h, wd, *, max_batch_block=256):
    assert h % 4 == 0 and wd % 4 == 0, "spatial dims must be divisible by 4"
    h1, w1, h2, w2 = h // 2, wd // 2, h // 4, wd // 4
    d0, d1, d2 = h * wd, h1 * w1, h2 * w2

    getw = lambda name: np.asarray(params[name][0], np.float32).reshape(4, 4)
    getb = lambda name: float(np.asarray(params[name][1]).reshape(-1)[0])

    m1f = conv_s2_matrix(getw("conv1F"), h, wd)      # (d0, d1)  16x16 -> 8x8
    m1b = convT_s2_matrix(getw("conv1B"), h1, w1)    # (d1, d0)  8x8  -> 16x16
    m2f = conv_s2_matrix(getw("conv2F"), h1, w1)     # (d1, d2)  8x8  -> 4x4
    m2b = convT_s2_matrix(getw("conv2B"), h2, w2)    # (d2, d1)  4x4  -> 8x8
    m3f = convT_s2_matrix(getw("conv3F"), h2, w2)    # (d2, d1)  4x4  -> 8x8
    m3b = conv_s2_matrix(getw("conv3B"), h1, w1)     # (d1, d2)  8x8  -> 4x4
    m4f = convT_s2_matrix(getw("conv4F"), h1, w1)    # (d1, d0)  8x8  -> 16x16
    m4b = conv_s2_matrix(getw("conv4B"), h, wd)      # (d0, d1)  16x16 -> 8x8

    # Merged shared-LHS RHS matrices (256-wide segment first for lane alignment).
    wa = np.concatenate([m1b, m2f], axis=1)          # (d1, d0+d2)
    wb = np.concatenate([m2b, m3f], axis=1)          # (d2, 2*d1)
    wc = np.concatenate([m4f, m3b], axis=1)          # (d1, d0+d2)
    mats = tuple(jnp.asarray(m) for m in (m1f, m4b, wa, wb, wc))

    bias = {"1F": getb("conv1F"), "1B": getb("conv1B"),
            "2F": getb("conv2F"), "2B": getb("conv2B"),
            "3F": getb("conv3F"), "3B": getb("conv3B"),
            "4F": getb("conv4F"), "4B": getb("conv4B")}

    layout, total = _build_layout(d0, d1, d2)
    kernel = functools.partial(_ubal_kernel, bias=bias, layout=layout,
                               dims=(d0, d1, d2))

    spatial = {"FP1": (h1, w1), "FP2": (h2, w2), "FP3": (h1, w1), "FP4": (h, wd),
               "FE0": (h, wd), "FE1": (h1, w1), "FE2": (h2, w2), "FE3": (h1, w1),
               "BP0": (h, wd), "BP1": (h1, w1), "BP2": (h2, w2), "BP3": (h1, w1),
               "BE1": (h1, w1), "BE2": (h2, w2), "BE3": (h1, w1), "BE4": (h, wd)}

    def fwd(input_x, input_y, m1f_d, m4b_d, wa_d, wb_d, wc_d):
        n = input_x.shape[0]
        assert input_x.shape[1] == 1 and input_y.shape == input_x.shape
        x_flat = input_x.reshape(n, d0).astype(jnp.float32)
        y_flat = input_y.reshape(n, d0).astype(jnp.float32)

        bm = n if n <= max_batch_block else max_batch_block
        n_pad = _round_up(n, bm)
        if n_pad != n:
            pad = ((0, n_pad - n), (0, 0))
            x_flat = jnp.pad(x_flat, pad)
            y_flat = jnp.pad(y_flat, pad)

        row_spec = pl.BlockSpec((bm, d0), lambda i: (i, 0))
        w_spec = lambda m: pl.BlockSpec(m.shape, lambda i: (0, 0))

        slab = pl.pallas_call(
            kernel,
            out_shape=jax.ShapeDtypeStruct((n_pad, total), jnp.float32),
            grid_spec=pltpu.PrefetchScalarGridSpec(
                num_scalar_prefetch=0,
                grid=(n_pad // bm,),
                in_specs=[row_spec, row_spec,
                          w_spec(m1f_d), w_spec(m4b_d),
                          w_spec(wa_d), w_spec(wb_d), w_spec(wc_d)],
                out_specs=pl.BlockSpec((bm, total), lambda i: (i, 0))),
            compiler_params=pltpu.CompilerParams(
                dimension_semantics=("parallel",)),
        )(x_flat, y_flat, m1f_d, m4b_d, wa_d, wb_d, wc_d)

        def grab(name):
            off, wdt = layout[name]
            hh, ww = spatial[name]
            return slab[:n, off:off + wdt].reshape(n, 1, hh, ww)

        FP = [input_x, grab("FP1"), grab("FP2"), grab("FP3"), grab("FP4")]
        FE = [grab("FE0"), grab("FE1"), grab("FE2"), grab("FE3"), None]
        BP = [grab("BP0"), grab("BP1"), grab("BP2"), grab("BP3"), input_y]
        BE = [None, grab("BE1"), grab("BE2"), grab("BE3"), grab("BE4")]
        return FP, BP, FE, BE

    fwd_jit = jax.jit(fwd)

    def run(input_x, input_y):
        return fwd_jit(input_x, input_y, *mats)

    return run


# ----------------------------------------------------------------------------
# Pure-numpy references (PyTorch semantics) for correctness checks.
# ----------------------------------------------------------------------------
def _ref_conv_s2(x, w, bias):
    n, h, wd = x.shape
    ho, wo = h // 2, wd // 2
    out = np.full((n, ho, wo), float(np.asarray(bias).reshape(-1)[0]), np.float32)
    w = np.asarray(w, np.float32).reshape(4, 4)
    for b in range(n):
        for i in range(ho):
            for j in range(wo):
                s = 0.0
                for kh in range(4):
                    for kw in range(4):
                        ii, jj = 2 * i - 1 + kh, 2 * j - 1 + kw
                        if 0 <= ii < h and 0 <= jj < wd:
                            s += float(w[kh, kw]) * float(x[b, ii, jj])
                out[b, i, j] += s
    return out


def _ref_convT_s2(x, w, bias):
    n, h, wd = x.shape
    ho, wo = 2 * h, 2 * wd
    out = np.full((n, ho, wo), float(np.asarray(bias).reshape(-1)[0]), np.float32)
    w = np.asarray(w, np.float32).reshape(4, 4)
    for b in range(n):
        for i in range(h):
            for j in range(wd):
                for kh in range(4):
                    for kw in range(4):
                        oi, oj = 2 * i - 1 + kh, 2 * j - 1 + kw
                        if 0 <= oi < ho and 0 <= oj < wo:
                            out[b, oi, oj] += float(w[kh, kw]) * float(x[b, i, j])
    return out


def _ref_forward(x, y, params):
    pw = {k: (np.asarray(w, np.float32).reshape(4, 4), np.asarray(b, np.float32))
          for k, (w, b) in params.items()}
    relu = lambda a: np.maximum(a, 0.0)
    sig = lambda a: 1.0 / (1.0 + np.exp(-a))
    c = lambda name, a: _ref_conv_s2(a, *pw[name])
    t = lambda name, a: _ref_convT_s2(a, *pw[name])
    FP = [None] * 5; BP = [None] * 5; FE = [None] * 5; BE = [None] * 5
    FP[0] = x
    FP[1] = relu(c("conv1F", FP[0]))
    FE[0] = relu(t("conv1B", FP[1]))
    FP[2] = relu(c("conv2F", FP[1]))
    FE[1] = relu(t("conv2B", FP[2]))
    FP[3] = relu(t("conv3F", FP[2]))
    FE[2] = relu(c("conv3B", FP[3]))
    FP[4] = sig(t("conv4F", FP[3]))
    FE[3] = relu(c("conv4B", FP[4]))
    BP[4] = y
    BP[3] = relu(c("conv4B", BP[4]))
    BE[4] = relu(t("conv4F", BP[3]))
    BP[2] = relu(c("conv3B", BP[3]))
    BE[3] = relu(t("conv3F", BP[2]))
    BP[1] = relu(t("conv2B", BP[2]))
    BE[2] = relu(c("conv2F", BP[1]))
    BP[0] = sig(t("conv1B", BP[1]))
    BE[1] = relu(c("conv1F", BP[0]))
    return FP, BP, FE, BE


def _check_all(got, ref, rtol=1e-4, atol=1e-4):
    for g_list, r_list in zip(got, ref):
        for g, r in zip(g_list, r_list):
            if g is None or r is None:
                assert g is None and r is None
                continue
            np.testing.assert_allclose(np.asarray(g)[:, 0], r, rtol=rtol, atol=atol)


if __name__ == "__main__":
    key = jax.random.PRNGKey(0)
    kx, ky = jax.random.split(key)

    N, H, W = 2, 16, 16
    input_x = jax.random.uniform(kx, (N, 1, H, W), dtype=jnp.float32)
    input_y = jax.random.uniform(ky, (N, 1, H, W), dtype=jnp.float32)

    # --- host-side check: dense operator matrices == PyTorch conv semantics --
    rng = np.random.default_rng(0)
    wr = rng.standard_normal((4, 4)).astype(np.float32)
    br = rng.standard_normal((1,)).astype(np.float32)
    xr = rng.standard_normal((2, 8, 8)).astype(np.float32)
    np.testing.assert_allclose(
        (xr.reshape(2, 64) @ conv_s2_matrix(wr, 8, 8) + br[0]).reshape(2, 4, 4),
        _ref_conv_s2(xr, wr, br), rtol=1e-5, atol=1e-5)
    np.testing.assert_allclose(
        (xr.reshape(2, 64) @ convT_s2_matrix(wr, 8, 8) + br[0]).reshape(2, 16, 16),
        _ref_convT_s2(xr, wr, br), rtol=1e-5, atol=1e-5)

    # --- 1) the module's actual parameters (weights 0.35, bias 1.0) ----------
    params = make_params()
    forward = make_ubal_forward(params, H, W)   # operators built once, forward jitted
    FP, BP, FE, BE = forward(input_x, input_y)
    jax.block_until_ready((FP, BP, FE, BE))

    assert FP[4].shape == (N, 1, H, W)
    assert BP[0].shape == (N, 1, H, W)
    assert FP[2].shape == (N, 1, H // 4, W // 4)

    ref = _ref_forward(np.asarray(input_x[:, 0]), np.asarray(input_y[:, 0]), params)
    _check_all((FP, BP, FE, BE), ref)

    # --- 2) distinct per-layer random weights/biases: catches any matrix/bias
    #        index swap that identical-parameter layers would mask -------------
    rng2 = np.random.default_rng(1)
    params2 = {name: (jnp.asarray(rng2.standard_normal((4, 4)) * 0.25, dtype=jnp.float32),
                      jnp.asarray(rng2.standard_normal((1,)), dtype=jnp.float32))
               for name in _LAYERS}
    forward2 = make_ubal_forward(params2, H, W)
    out2 = forward2(input_x, input_y)
    jax.block_until_ready(out2)
    ref2 = _ref_forward(np.asarray(input_x[:, 0]), np.asarray(input_y[:, 0]), params2)
    _check_all(out2, ref2)

    print("KERNEL_OK")
</pallas_src>

<mosaic_0001>
module attributes {stable_mosaic.version = 11 : i64} {
  func.func @_ubal_kernel(%arg0: i32, %arg1: memref<2x256xf32, #tpu.memory_space<vmem>>, %arg2: memref<2x256xf32, #tpu.memory_space<vmem>>, %arg3: memref<256x64xf32, #tpu.memory_space<vmem>>, %arg4: memref<256x64xf32, #tpu.memory_space<vmem>>, %arg5: memref<64x272xf32, #tpu.memory_space<vmem>>, %arg6: memref<16x128xf32, #tpu.memory_space<vmem>>, %arg7: memref<64x272xf32, #tpu.memory_space<vmem>>, %arg8: memref<2x2560xf32, #tpu.memory_space<vmem>>) attributes {dimension_semantics = [#tpu.dimension_semantics<parallel>], iteration_bounds = array<i64: 1>, scalar_prefetch = 0 : i64, scratch_operands = 0 : i64, tpu.core_type = #tpu.core_type<tc>, window_params = [{transform_indices = @transform_0, window_bounds = array<i64: 2, 256>}, {transform_indices = @transform_1, window_bounds = array<i64: 2, 256>}, {pipeline_mode = #tpu.pipeline_mode<synchronous>, transform_indices = @transform_2, window_bounds = array<i64: 256, 64>}, {pipeline_mode = #tpu.pipeline_mode<synchronous>, transform_indices = @transform_3, window_bounds = array<i64: 256, 64>}, {pipeline_mode = #tpu.pipeline_mode<synchronous>, transform_indices = @transform_4, window_bounds = array<i64: 64, 272>}, {pipeline_mode = #tpu.pipeline_mode<synchronous>, transform_indices = @transform_5, window_bounds = array<i64: 16, 128>}, {pipeline_mode = #tpu.pipeline_mode<synchronous>, transform_indices = @transform_6, window_bounds = array<i64: 64, 272>}, {transform_indices = @transform_7, window_bounds = array<i64: 2, 2560>}]} {
    %cst = arith.constant 0.000000e+00 : f32
    %0 = vector.broadcast %cst : f32 to vector<2x2560xf32>
    %c0 = arith.constant 0 : index
    %c0_0 = arith.constant 0 : index
    %1 = vector.load %arg8[%c0, %c0_0] : memref<2x2560xf32, #tpu.memory_space<vmem>>, vector<2x2560xf32>
    tpu.vector_store %arg8[%c0, %c0_0], %0 {strides = array<i32>} : memref<2x2560xf32, #tpu.memory_space<vmem>>, vector<2x2560xf32>,
    %c0_1 = arith.constant 0 : index
    %c0_2 = arith.constant 0 : index
    %2 = vector.load %arg1[%c0_1, %c0_2] : memref<2x256xf32, #tpu.memory_space<vmem>>, vector<2x256xf32>
    %c0_3 = arith.constant 0 : index
    %c0_4 = arith.constant 0 : index
    %3 = vector.load %arg2[%c0_3, %c0_4] : memref<2x256xf32, #tpu.memory_space<vmem>>, vector<2x256xf32>
    %c0_5 = arith.constant 0 : index
    %c0_6 = arith.constant 0 : index
    %4 = vector.load %arg3[%c0_5, %c0_6] : memref<256x64xf32, #tpu.memory_space<vmem>>, vector<256x64xf32>
    %cst_7 = arith.constant dense<0.000000e+00> : vector<2x64xf32>
    %5 = tpu.matmul %2, %4, %cst_7 {dimension_numbers = #tpu.dot_dimension_numbers<[1], [0], [0], [1], [0, 0, 1, 1], [], []>} : vector<2x256xf32>, vector<256x64xf32>, vector<2x64xf32> -> vector<2x64xf32>
    %cst_8 = arith.constant 1.000000e+00 : f32
    %6 = vector.broadcast %cst_8 : f32 to vector<2x64xf32>
    %7 = arith.addf %5, %6 : vector<2x64xf32>
    %cst_9 = arith.constant 0.000000e+00 : f32
    %8 = vector.broadcast %cst_9 : f32 to vector<2x64xf32>
    %9 = arith.maximumf %7, %8 : vector<2x64xf32>
    %c0_10 = arith.constant 0 : index
    %c0_11 = arith.constant 0 : index
    %10 = vector.load %arg8[%c0_10, %c0_11] : memref<2x2560xf32, #tpu.memory_space<vmem>>, vector<2x64xf32>
    tpu.vector_store %arg8[%c0_10, %c0_11], %9 {strides = array<i32>} : memref<2x2560xf32, #tpu.memory_space<vmem>>, vector<2x64xf32>,
    %c0_12 = arith.constant 0 : index
    %c0_13 = arith.constant 0 : index
    %11 = vector.load %arg5[%c0_12, %c0_13] : memref<64x272xf32, #tpu.memory_space<vmem>>, vector<64x272xf32>
    %cst_14 = arith.constant dense<0.000000e+00> : vector<2x272xf32>
    %12 = tpu.matmul %9, %11, %cst_14 {dimension_numbers = #tpu.dot_dimension_numbers<[1], [0], [0], [1], [0, 0, 1, 1], [], []>} : vector<2x64xf32>, vector<64x272xf32>, vector<2x272xf32> -> vector<2x272xf32>
    %13 = vector.extract_strided_slice %12 {offsets = [0, 0], sizes = [2, 256], strides = [1, 1]} : vector<2x272xf32> to vector<2x256xf32>
    %cst_15 = arith.constant 1.000000e+00 : f32
    %14 = vector.broadcast %cst_15 : f32 to vector<2x256xf32>
    %15 = arith.addf %13, %14 : vector<2x256xf32>
    %cst_16 = arith.constant 0.000000e+00 : f32
    %16 = vector.broadcast %cst_16 : f32 to vector<2x256xf32>
    %17 = arith.maximumf %15, %16 : vector<2x256xf32>
    %c0_17 = arith.constant 0 : index
    %c640 = arith.constant 640 : index
    %18 = vector.load %arg8[%c0_17, %c640] : memref<2x2560xf32, #tpu.memory_space<vmem>>, vector<2x256xf32>
    tpu.vector_store %arg8[%c0_17, %c640], %17 {strides = array<i32>} : memref<2x2560xf32, #tpu.memory_space<vmem>>, vector<2x256xf32>,
    %19 = vector.extract_strided_slice %12 {offsets = [0, 256], sizes = [2, 16], strides = [1, 1]} : vector<2x272xf32> to vector<2x16xf32>
    %cst_18 = arith.constant 1.000000e+00 : f32
    %20 = vector.broadcast %cst_18 : f32 to vector<2x16xf32>
    %21 = arith.addf %19, %20 : vector<2x16xf32>
    %cst_19 = arith.constant 0.000000e+00 : f32
    %22 = vector.broadcast %cst_19 : f32 to vector<2x16xf32>
    %23 = arith.maximumf %21, %22 : vector<2x16xf32>
    %c0_20 = arith.constant 0 : index
    %c128 = arith.constant 128 : index
    %24 = vector.load %arg8[%c0_20, %c128] : memref<2x2560xf32, #tpu.memory_space<vmem>>, vector<2x16xf32>
    tpu.vector_store %arg8[%c0_20, %c128], %23 {strides = array<i32>} : memref<2x2560xf32, #tpu.memory_space<vmem>>, vector<2x16xf32>,
    %c0_21 = arith.constant 0 : index
    %c0_22 = arith.constant 0 : index
    %25 = vector.load %arg6[%c0_21, %c0_22] : memref<16x128xf32, #tpu.memory_space<vmem>>, vector<16x128xf32>
    %cst_23 = arith.constant dense<0.000000e+00> : vector<2x128xf32>
    %26 = tpu.matmul %23, %25, %cst_23 {dimension_numbers = #tpu.dot_dimension_numbers<[1], [0], [0], [1], [0, 0, 1, 1], [], []>} : vector<2x16xf32>, vector<16x128xf32>, vector<2x128xf32> -> vector<2x128xf32>
    %27 = vector.extract_strided_slice %26 {offsets = [0, 0], sizes = [2, 64], strides = [1, 1]} : vector<2x128xf32> to vector<2x64xf32>
    %cst_24 = arith.constant 1.000000e+00 : f32
    %28 = vector.broadcast %cst_24 : f32 to vector<2x64xf32>
    %29 = arith.addf %27, %28 : vector<2x64xf32>
    %cst_25 = arith.constant 0.000000e+00 : f32
    %30 = vector.broadcast %cst_25 : f32 to vector<2x64xf32>
    %31 = arith.maximumf %29, %30 : vector<2x64xf32>
    %c0_26 = arith.constant 0 : index
    %c896 = arith.constant 896 : index
    %32 = vector.load %arg8[%c0_26, %c896] : memref<2x2560xf32, #tpu.memory_space<vmem>>, vector<2x64xf32>
    tpu.vector_store %arg8[%c0_26, %c896], %31 {strides = array<i32>} : memref<2x2560xf32, #tpu.memory_space<vmem>>, vector<2x64xf32>,
    %33 = vector.extract_strided_slice %26 {offsets = [0, 64], sizes = [2, 64], strides = [1, 1]} : vector<2x128xf32> to vector<2x64xf32>
    %cst_27 = arith.constant 1.000000e+00 : f32
    %34 = vector.broadcast %cst_27 : f32 to vector<2x64xf32>
    %35 = arith.addf %33, %34 : vector<2x64xf32>
    %cst_28 = arith.constant 0.000000e+00 : f32
    %36 = vector.broadcast %cst_28 : f32 to vector<2x64xf32>
    %37 = arith.maximumf %35, %36 : vector<2x64xf32>
    %c0_29 = arith.constant 0 : index
    %c256 = arith.constant 256 : index
    %38 = vector.load %arg8[%c0_29, %c256] : memref<2x2560xf32, #tpu.memory_space<vmem>>, vector<2x64xf32>
    tpu.vector_store %arg8[%c0_29, %c256], %37 {strides = array<i32>} : memref<2x2560xf32, #tpu.memory_space<vmem>>, vector<2x64xf32>,
    %c0_30 = arith.constant 0 : index
    %c0_31 = arith.constant 0 : index
    %39 = vector.load %arg7[%c0_30, %c0_31] : memref<64x272xf32, #tpu.memory_space<vmem>>, vector<64x272xf32>
    %cst_32 = arith.constant dense<0.000000e+00> : vector<2x272xf32>
    %40 = tpu.matmul %37, %39, %cst_32 {dimension_numbers = #tpu.dot_dimension_numbers<[1], [0], [0], [1], [0, 0, 1, 1], [], []>} : vector<2x64xf32>, vector<64x272xf32>, vector<2x272xf32> -> vector<2x272xf32>
    %41 = vector.extract_strided_slice %40 {offsets = [0, 0], sizes = [2, 256], strides = [1, 1]} : vector<2x272xf32> to vector<2x256xf32>
    %cst_33 = arith.constant 1.000000e+00 : f32
    %42 = vector.broadcast %cst_33 : f32 to vector<2x256xf32>
    %43 = arith.addf %41, %42 : vector<2x256xf32>
    %44 = arith.negf %43 : vector<2x256xf32>
    %45 = math.exp %44 : vector<2x256xf32>
    %cst_34 = arith.constant 1.000000e+00 : f32
    %46 = vector.broadcast %cst_34 : f32 to vector<2x256xf32>
    %47 = arith.addf %46, %45 : vector<2x256xf32>
    %48 = arith.divf %46, %47 : vector<2x256xf32>
    %c0_35 = arith.constant 0 : index
    %c384 = arith.constant 384 : index
    %49 = vector.load %arg8[%c0_35, %c384] : memref<2x2560xf32, #tpu.memory_space<vmem>>, vector<2x256xf32>
    tpu.vector_store %arg8[%c0_35, %c384], %48 {strides = array<i32>} : memref<2x2560xf32, #tpu.memory_space<vmem>>, vector<2x256xf32>,
    %50 = vector.extract_strided_slice %40 {offsets = [0, 256], sizes = [2, 16], strides = [1, 1]} : vector<2x272xf32> to vector<2x16xf32>
    %cst_36 = arith.constant 1.000000e+00 : f32
    %51 = vector.broadcast %cst_36 : f32 to vector<2x16xf32>
    %52 = arith.addf %50, %51 : vector<2x16xf32>
    %cst_37 = arith.constant 0.000000e+00 : f32
    %53 = vector.broadcast %cst_37 : f32 to vector<2x16xf32>
    %54 = arith.maximumf %52, %53 : vector<2x16xf32>
    %c0_38 = arith.constant 0 : index
    %c1024 = arith.constant 1024 : index
    %55 = vector.load %arg8[%c0_38, %c1024] : memref<2x2560xf32, #tpu.memory_space<vmem>>, vector<2x16xf32>
    tpu.vector_store %arg8[%c0_38, %c1024], %54 {strides = array<i32>} : memref<2x2560xf32, #tpu.memory_space<vmem>>, vector<2x16xf32>,
    %c0_39 = arith.constant 0 : index
    %c0_40 = arith.constant 0 : index
    %56 = vector.load %arg4[%c0_39, %c0_40] : memref<256x64xf32, #tpu.memory_space<vmem>>, vector<256x64xf32>
    %cst_41 = arith.constant dense<0.000000e+00> : vector<2x64xf32>
    %57 = tpu.matmul %48, %56, %cst_41 {dimension_numbers = #tpu.dot_dimension_numbers<[1], [0], [0], [1], [0, 0, 1, 1], [], []>} : vector<2x256xf32>, vector<256x64xf32>, vector<2x64xf32> -> vector<2x64xf32>
    %cst_42 = arith.constant 1.000000e+00 : f32
    %58 = vector.broadcast %cst_42 : f32 to vector<2x64xf32>
    %59 = arith.addf %57, %58 : vector<2x64xf32>
    %cst_43 = arith.constant 0.000000e+00 : f32
    %60 = vector.broadcast %cst_43 : f32 to vector<2x64xf32>
    %61 = arith.maximumf %59, %60 : vector<2x64xf32>
    %c0_44 = arith.constant 0 : index
    %c1152 = arith.constant 1152 : index
    %62 = vector.load %arg8[%c0_44, %c1152] : memref<2x2560xf32, #tpu.memory_space<vmem>>, vector<2x64xf32>
    tpu.vector_store %arg8[%c0_44, %c1152], %61 {strides = array<i32>} : memref<2x2560xf32, #tpu.memory_space<vmem>>, vector<2x64xf32>,
    %c0_45 = arith.constant 0 : index
    %c0_46 = arith.constant 0 : index
    %63 = vector.load %arg4[%c0_45, %c0_46] : memref<256x64xf32, #tpu.memory_space<vmem>>, vector<256x64xf32>
    %cst_47 = arith.constant dense<0.000000e+00> : vector<2x64xf32>
    %64 = tpu.matmul %3, %63, %cst_47 {dimension_numbers = #tpu.dot_dimension_numbers<[1], [0], [0], [1], [0, 0, 1, 1], [], []>} : vector<2x256xf32>, vector<256x64xf32>, vector<2x64xf32> -> vector<2x64xf32>
    %cst_48 = arith.constant 1.000000e+00 : f32
    %65 = vector.broadcast %cst_48 : f32 to vector<2x64xf32>
    %66 = arith.addf %64, %65 : vector<2x64xf32>
    %cst_49 = arith.constant 0.000000e+00 : f32
    %67 = vector.broadcast %cst_49 : f32 to vector<2x64xf32>
    %68 = arith.maximumf %66, %67 : vector<2x64xf32>
    %c0_50 = arith.constant 0 : index
    %c1792 = arith.constant 1792 : index
    %69 = vector.load %arg8[%c0_50, %c1792] : memref<2x2560xf32, #tpu.memory_space<vmem>>, vector<2x64xf32>
    tpu.vector_store %arg8[%c0_50, %c1792], %68 {strides = array<i32>} : memref<2x2560xf32, #tpu.memory_space<vmem>>, vector<2x64xf32>,
    %c0_51 = arith.constant 0 : index
    %c0_52 = arith.constant 0 : index
    %70 = vector.load %arg7[%c0_51, %c0_52] : memref<64x272xf32, #tpu.memory_space<vmem>>, vector<64x272xf32>
    %cst_53 = arith.constant dense<0.000000e+00> : vector<2x272xf32>
    %71 = tpu.matmul %68, %70, %cst_53 {dimension_numbers = #tpu.dot_dimension_numbers<[1], [0], [0], [1], [0, 0, 1, 1], [], []>} : vector<2x64xf32>, vector<64x272xf32>, vector<2x272xf32> -> vector<2x272xf32>
    %72 = vector.extract_strided_slice %71 {offsets = [0, 0], sizes = [2, 256], strides = [1, 1]} : vector<2x272xf32> to vector<2x256xf32>
    %cst_54 = arith.constant 1.000000e+00 : f32
    %73 = vector.broadcast %cst_54 : f32 to vector<2x256xf32>
    %74 = arith.addf %72, %73 : vector<2x256xf32>
    %cst_55 = arith.constant 0.000000e+00 : f32
    %75 = vector.broadcast %cst_55 : f32 to vector<2x256xf32>
    %76 = arith.maximumf %74, %75 : vector<2x256xf32>
    %c0_56 = arith.constant 0 : index
    %c2304 = arith.constant 2304 : index
    %77 = vector.load %arg8[%c0_56, %c2304] : memref<2x2560xf32, #tpu.memory_space<vmem>>, vector<2x256xf32>
    tpu.vector_store %arg8[%c0_56, %c2304], %76 {strides = array<i32>} : memref<2x2560xf32, #tpu.memory_space<vmem>>, vector<2x256xf32>,
    %78 = vector.extract_strided_slice %71 {offsets = [0, 256], sizes = [2, 16], strides = [1, 1]} : vector<2x272xf32> to vector<2x16xf32>
    %cst_57 = arith.constant 1.000000e+00 : f32
    %79 = vector.broadcast %cst_57 : f32 to vector<2x16xf32>
    %80 = arith.addf %78, %79 : vector<2x16xf32>
    %cst_58 = arith.constant 0.000000e+00 : f32
    %81 = vector.broadcast %cst_58 : f32 to vector<2x16xf32>
    %82 = arith.maximumf %80, %81 : vector<2x16xf32>
    %c0_59 = arith.constant 0 : index
    %c1664 = arith.constant 1664 : index
    %83 = vector.load %arg8[%c0_59, %c1664] : memref<2x2560xf32, #tpu.memory_space<vmem>>, vector<2x16xf32>
    tpu.vector_store %arg8[%c0_59, %c1664], %82 {strides = array<i32>} : memref<2x2560xf32, #tpu.memory_space<vmem>>, vector<2x16xf32>,
    %c0_60 = arith.constant 0 : index
    %c0_61 = arith.constant 0 : index
    %84 = vector.load %arg6[%c0_60, %c0_61] : memref<16x128xf32, #tpu.memory_space<vmem>>, vector<16x128xf32>
    %cst_62 = arith.constant dense<0.000000e+00> : vector<2x128xf32>
    %85 = tpu.matmul %82, %84, %cst_62 {dimension_numbers = #tpu.dot_dimension_numbers<[1], [0], [0], [1], [0, 0, 1, 1], [], []>} : vector<2x16xf32>, vector<16x128xf32>, vector<2x128xf32> -> vector<2x128xf32>
    %86 = vector.extract_strided_slice %85 {offsets = [0, 0], sizes = [2, 64], strides = [1, 1]} : vector<2x128xf32> to vector<2x64xf32>
    %cst_63 = arith.constant 1.000000e+00 : f32
    %87 = vector.broadcast %cst_63 : f32 to vector<2x64xf32>
    %88 = arith.addf %86, %87 : vector<2x64xf32>
    %cst_64 = arith.constant 0.000000e+00 : f32
    %89 = vector.broadcast %cst_64 : f32 to vector<2x64xf32>
    %90 = arith.maximumf %88, %89 : vector<2x64xf32>
    %c0_65 = arith.constant 0 : index
    %c1536 = arith.constant 1536 : index
    %91 = vector.load %arg8[%c0_65, %c1536] : memref<2x2560xf32, #tpu.memory_space<vmem>>, vector<2x64xf32>
    tpu.vector_store %arg8[%c0_65, %c1536], %90 {strides = array<i32>} : memref<2x2560xf32, #tpu.memory_space<vmem>>, vector<2x64xf32>,
    %92 = vector.extract_strided_slice %85 {offsets = [0, 64], sizes = [2, 64], strides = [1, 1]} : vector<2x128xf32> to vector<2x64xf32>
    %cst_66 = arith.constant 1.000000e+00 : f32
    %93 = vector.broadcast %cst_66 : f32 to vector<2x64xf32>
    %94 = arith.addf %92, %93 : vector<2x64xf32>
    %cst_67 = arith.constant 0.000000e+00 : f32
    %95 = vector.broadcast %cst_67 : f32 to vector<2x64xf32>
    %96 = arith.maximumf %94, %95 : vector<2x64xf32>
    %c0_68 = arith.constant 0 : index
    %c2176 = arith.constant 2176 : index
    %97 = vector.load %arg8[%c0_68, %c2176] : memref<2x2560xf32, #tpu.memory_space<vmem>>, vector<2x64xf32>
    tpu.vector_store %arg8[%c0_68, %c2176], %96 {strides = array<i32>} : memref<2x2560xf32, #tpu.memory_space<vmem>>, vector<2x64xf32>,
    %c0_69 = arith.constant 0 : index
    %c0_70 = arith.constant 0 : index
    %98 = vector.load %arg5[%c0_69, %c0_70] : memref<64x272xf32, #tpu.memory_space<vmem>>, vector<64x272xf32>
    %cst_71 = arith.constant dense<0.000000e+00> : vector<2x272xf32>
    %99 = tpu.matmul %90, %98, %cst_71 {dimension_numbers = #tpu.dot_dimension_numbers<[1], [0], [0], [1], [0, 0, 1, 1], [], []>} : vector<2x64xf32>, vector<64x272xf32>, vector<2x272xf32> -> vector<2x272xf32>
    %100 = vector.extract_strided_slice %99 {offsets = [0, 0], sizes = [2, 256], strides = [1, 1]} : vector<2x272xf32> to vector<2x256xf32>
    %cst_72 = arith.constant 1.000000e+00 : f32
    %101 = vector.broadcast %cst_72 : f32 to vector<2x256xf32>
    %102 = arith.addf %100, %101 : vector<2x256xf32>
    %103 = arith.negf %102 : vector<2x256xf32>
    %104 = math.exp %103 : vector<2x256xf32>
    %cst_73 = arith.constant 1.000000e+00 : f32
    %105 = vector.broadcast %cst_73 : f32 to vector<2x256xf32>
    %106 = arith.addf %105, %104 : vector<2x256xf32>
    %107 = arith.divf %105, %106 : vector<2x256xf32>
    %c0_74 = arith.constant 0 : index
    %c1280 = arith.constant 1280 : index
    %108 = vector.load %arg8[%c0_74, %c1280] : memref<2x2560xf32, #tpu.memory_space<vmem>>, vector<2x256xf32>
    tpu.vector_store %arg8[%c0_74, %c1280], %107 {strides = array<i32>} : memref<2x2560xf32, #tpu.memory_space<vmem>>, vector<2x256xf32>,
    %109 = vector.extract_strided_slice %99 {offsets = [0, 256], sizes = [2, 16], strides = [1, 1]} : vector<2x272xf32> to vector<2x16xf32>
    %cst_75 = arith.constant 1.000000e+00 : f32
    %110 = vector.broadcast %cst_75 : f32 to vector<2x16xf32>
    %111 = arith.addf %109, %110 : vector<2x16xf32>
    %cst_76 = arith.constant 0.000000e+00 : f32
    %112 = vector.broadcast %cst_76 : f32 to vector<2x16xf32>
    %113 = arith.maximumf %111, %112 : vector<2x16xf32>
    %c0_77 = arith.constant 0 : index
    %c2048 = arith.constant 2048 : index
    %114 = vector.load %arg8[%c0_77, %c2048] : memref<2x2560xf32, #tpu.memory_space<vmem>>, vector<2x16xf32>
    tpu.vector_store %arg8[%c0_77, %c2048], %113 {strides = array<i32>} : memref<2x2560xf32, #tpu.memory_space<vmem>>, vector<2x16xf32>,
    %c0_78 = arith.constant 0 : index
    %c0_79 = arith.constant 0 : index
    %115 = vector.load %arg3[%c0_78, %c0_79] : memref<256x64xf32, #tpu.memory_space<vmem>>, vector<256x64xf32>
    %cst_80 = arith.constant dense<0.000000e+00> : vector<2x64xf32>
    %116 = tpu.matmul %107, %115, %cst_80 {dimension_numbers = #tpu.dot_dimension_numbers<[1], [0], [0], [1], [0, 0, 1, 1], [], []>} : vector<2x256xf32>, vector<256x64xf32>, vector<2x64xf32> -> vector<2x64xf32>
    %cst_81 = arith.constant 1.000000e+00 : f32
    %117 = vector.broadcast %cst_81 : f32 to vector<2x64xf32>
    %118 = arith.addf %116, %117 : vector<2x64xf32>
    %cst_82 = arith.constant 0.000000e+00 : f32
    %119 = vector.broadcast %cst_82 : f32 to vector<2x64xf32>
    %120 = arith.maximumf %118, %119 : vector<2x64xf32>
    %c0_83 = arith.constant 0 : index
    %c1920 = arith.constant 1920 : index
    %121 = vector.load %arg8[%c0_83, %c1920] : memref<2x2560xf32, #tpu.memory_space<vmem>>, vector<2x64xf32>
    tpu.vector_store %arg8[%c0_83, %c1920], %120 {strides = array<i32>} : memref<2x2560xf32, #tpu.memory_space<vmem>>, vector<2x64xf32>,
    return
  }
  func.func @transform_0(%arg0: i32) -> (i32, i32) {
    %c0_i32 = arith.constant 0 : i32
    %c0_i32_0 = arith.constant 0 : i32
    return %arg0, %c0_i32 : i32, i32
  }
  func.func @transform_1(%arg0: i32) -> (i32, i32) {
    %c0_i32 = arith.constant 0 : i32
    %c0_i32_0 = arith.constant 0 : i32
    return %arg0, %c0_i32 : i32, i32
  }
  func.func @transform_2(%arg0: i32) -> (i32, i32) {
    %c0_i32 = arith.constant 0 : i32
    %c0_i32_0 = arith.constant 0 : i32
    %c0_i32_1 = arith.constant 0 : i32
    return %c0_i32, %c0_i32_0 : i32, i32
  }
  func.func @transform_3(%arg0: i32) -> (i32, i32) {
    %c0_i32 = arith.constant 0 : i32
    %c0_i32_0 = arith.constant 0 : i32
    %c0_i32_1 = arith.constant 0 : i32
    return %c0_i32, %c0_i32_0 : i32, i32
  }
  func.func @transform_4(%arg0: i32) -> (i32, i32) {
    %c0_i32 = arith.constant 0 : i32
    %c0_i32_0 = arith.constant 0 : i32
    %c0_i32_1 = arith.constant 0 : i32
    return %c0_i32, %c0_i32_0 : i32, i32
  }
  func.func @transform_5(%arg0: i32) -> (i32, i32) {
    %c0_i32 = arith.constant 0 : i32
    %c0_i32_0 = arith.constant 0 : i32
    %c0_i32_1 = arith.constant 0 : i32
    return %c0_i32, %c0_i32_0 : i32, i32
  }
  func.func @transform_6(%arg0: i32) -> (i32, i32) {
    %c0_i32 = arith.constant 0 : i32
    %c0_i32_0 = arith.constant 0 : i32
    %c0_i32_1 = arith.constant 0 : i32
    return %c0_i32, %c0_i32_0 : i32, i32
  }
  func.func @transform_7(%arg0: i32) -> (i32, i32) {
    %c0_i32 = arith.constant 0 : i32
    %c0_i32_0 = arith.constant 0 : i32
    return %arg0, %c0_i32 : i32, i32
  }
}

</mosaic_0001>

<bundles_post_ra>
// kernel: fwd.1
= control target key start
LH: loop header
LB: loop body
LE: loop exit
PB: predicated region body
PF: predicated region fallthrough
CT: control target
= control target key end

     0   :  { %vm1988_vm0 = vmmov 0   ;;  %vm173_vm1 = vcmask 523264   ;;  %vm147_vm2 = vcmask 517120   ;;  %vm340_vm3 = vcmask 130048   ;;  %s1990_s20 = smov 64   ;;  %s2764_s2 = inlined_call_operand.vmem [shape: f32[256,64], index: 2, kind: input, shape index: {}]   ;;  %s2765_s0 = inlined_call_operand.vmem [shape: f32[2,256], index: 0, kind: input, shape index: {}]   ;;  %s2766_s4 = inlined_call_operand.vmem [shape: f32[64,272], index: 4, kind: input, shape index: {}]   ;;  %s2767_s7 = inlined_call_operand.vmem [shape: f32[2,2560], index: 7, kind: output, shape index: {}]   ;;  %s2768_s5 = inlined_call_operand.vmem [shape: f32[16,128], index: 5, kind: input, shape index: {}]   ;;  %s2769_s3 = inlined_call_operand.vmem [shape: f32[256,64], index: 3, kind: input, shape index: {}]   ;;  %s2770_s1 = inlined_call_operand.vmem [shape: f32[2,256], index: 1, kind: input, shape index: {}]   ;;  %s2771_s6 = inlined_call_operand.vmem [shape: f32[64,272], index: 6, kind: input, shape index: {}]  }
   0x1   :  { %v49_v0 = vld [vmem:[%s2764_s2 + $0x80] sm:$0xff]  ;;  %v50_v1 = vld [vmem:[%s2764_s2 + $0x88] sm:$0xff]  ;;  %v51_v5 = vld [vmem:[%s2764_s2 + $0x90] sm:$0xff]  ;;  %vm336_vm4 = vcmask 123904  }
   0x2   :  { %v33_v2 = vld [vmem:[%s2764_s2] sm:$0xff]  ;;  %v1719_v3 = vpack.c.bf16 %v50_v1, %v49_v0  ;;  %v34_v4 = vld [vmem:[%s2764_s2 + $0x8] sm:$0xff]  ;;  %v52_v6 = vld [vmem:[%s2764_s2 + $0x98] sm:$0xff] }
   0x3   :  { %v1721_v7 = vpack.c.bf16 %v34_v4, %v33_v2  ;;  %v1723_v8 = vpack.c.bf16 %v52_v6, %v51_v5  ;;  %v35_v9 = vld [vmem:[%s2764_s2 + $0x10] sm:$0xff]  ;;  %v36_v10 = vld [vmem:[%s2764_s2 + $0x18] sm:$0xff]  ;;  %v53_v11 = vld [vmem:[%s2764_s2 + $0xa0] sm:$0xff] }
   0x4   :  { %1720 = vmatprep.subr.bf16.mxu0 %v1719_v3  ;;  %v54_v12 = vld [vmem:[%s2764_s2 + $0xa8] sm:$0xff]  ;;  %v1725_v13 = vpack.c.bf16 %v36_v10, %v35_v9  ;;  %v37_v15 = vld [vmem:[%s2764_s2 + $0x20] sm:$0xff]  ;;  %v55_v17 = vld [vmem:[%s2764_s2 + $0xb0] sm:$0xff]  ;;  %v1986_v10 = vmov 0.0  }
   0x5   :  { %1722 = vmatpush3.bf16.msra.mxu0 %v1721_v7  ;;  %v1727_v14 = vpack.c.bf16 %v54_v12, %v53_v11  ;;  %v38_v16 = vld [vmem:[%s2764_s2 + $0x28] sm:$0xff]  ;;  %v56_v18 = vld [vmem:[%s2764_s2 + $0xb8] sm:$0xff]  ;;  %v39_v21 = vld [vmem:[%s2764_s2 + $0x30] sm:$0xff]  ;;  %241 = vmatprep.mubr.f32.mxu1 %v1986_v10  ;;  %v1987_v11 = vmov 0.0|0.0   ;;  %27 = vst [vmem:[%s2767_s7 + $0x8] sm:$0xff] %v1986_v10 }
   0x6   :  { %1724 = vmatprep.subr.bf16.mxu0 %v1723_v8  ;;  %v1729_v19 = vpack.c.bf16 %v38_v16, %v37_v15  ;;  %v1731_v20 = vpack.c.bf16 %v56_v18, %v55_v17  ;;  %v40_v22 = vld [vmem:[%s2764_s2 + $0x38] sm:$0xff]  ;;  %v57_v23 = vld [vmem:[%s2764_s2 + $0xc0] sm:$0xff]  ;;  %v58_v24 = vld [vmem:[%s2764_s2 + $0xc8] sm:$0xff]  ;;  %26 = vst [vmem:[%s2767_s7] sm:$0xff] %v1986_v10 }
   0x7   :  { %v1427_v25 = vld.sshfl [vmem:[%s2765_s0] sm:$0x33 pattern:$0x76325410]  ;;  %v42_v27 = vld [vmem:[%s2764_s2 + $0x48] sm:$0xff]  ;;  %v1733_v32 = vpack.c.bf16 %v40_v22, %v39_v21  ;;  %v152_v34 = vld [vmem:[%s2766_s4 + $0x18] sm:$0xff]  ;;  %v1735_v37 = vpack.c.bf16 %v58_v24, %v57_v23 }
   0x8   :  { %v41_v26 = vld [vmem:[%s2764_s2 + $0x40] sm:$0xff]  ;;  %v73_v28 = vcombine.high %v1427_v25, %v1427_v25  ;;  %v150_v29 = vld [vmem:[%s2766_s4 + $0x8] sm:$0xff]  ;;  %v156_v35 = vld [vmem:[%s2766_s4 + $0x38] sm:$0xff]  ;;  %28 = vst [vmem:[%s2767_s7 + $0x10] sm:$0xff] %v1986_v10 }
   0x9   :  { %1726 = vmatpush3.bf16.msra.mxu0 %v1725_v13  ;;  %v153_v30 = vld [vmem:[%s2766_s4 + $0x20] sm:$0xff]  ;;  %v159_v36 = vld [vmem:[%s2766_s4 + $0x50] sm:$0xff]  ;;  %v158_v41 = vld [vmem:[%s2766_s4 + $0x48] sm:$0xff]  ;;  %v1737_v47 = vpack.c.bf16 %v42_v27, %v41_v26  ;;  %29 = vst [vmem:[%s2767_s7 + $0x18] sm:$0xff] %v1986_v10 }
   0xa   :  { %1728 = vmatprep.subr.bf16.mxu0 %v1727_v14  ;;  %v149_v31 = vld [vmem:[%s2766_s4] sm:$0xff]  ;;  %v2103_v33 = vpack.c.bf16 %v153_v30, %v150_v29  ;;  %140 = vmatprep.mubr.f32.mxu0 %v73_v28  ;;  %v2116_v39 = vpack.c.bf16 %v159_v36, %v156_v35  ;;  %v155_v40 = vld [vmem:[%s2766_s4 + $0x30] sm:$0xff]  ;;  %v162_v42 = vld [vmem:[%s2766_s4 + $0x68] sm:$0xff]  ;;  %30 = vst [vmem:[%s2767_s7 + $0x20] sm:$0xff] %v1986_v10 }
   0xb   :  { %v2114_v38 = vpack.c.bf16 %v152_v34, %v149_v31  ;;  %v59_v43 = vld [vmem:[%s2764_s2 + $0xd0] sm:$0xff]  ;;  %v60_v44 = vld [vmem:[%s2764_s2 + $0xd8] sm:$0xff]  ;;  %v165_v45 = vld [vmem:[%s2766_s4 + $0x80] sm:$0xff]  ;;  %v2138_v46 = vpack.c.bf16 %v158_v41, %v155_v40 }
   0xc   :  { %1752 = vmatprep.subr.bf16.mxu1 %v2103_v33  ;;  %v2141_v48 = vpack.c.bf16 %v165_v45, %v162_v42  ;;  %v1739_v49 = vpack.c.bf16 %v60_v44, %v59_v43  ;;  %v43_v50 = vld [vmem:[%s2764_s2 + $0x50] sm:$0xff]  ;;  %v44_v51 = vld [vmem:[%s2764_s2 + $0x58] sm:$0xff]  ;;  %v61_v52 = vld [vmem:[%s2764_s2 + $0xe0] sm:$0xff] }
   0xd   :  { %1730 = vmatpush3.bf16.msra.mxu0 %v1729_v19  ;;  %1754 = vmatpush1.bf16.msra.mxu1 %v2114_v38  ;;  %v62_v53 = vld [vmem:[%s2764_s2 + $0xe8] sm:$0xff]  ;;  %v1741_v54 = vpack.c.bf16 %v44_v51, %v43_v50  ;;  %v45_v56 = vld [vmem:[%s2764_s2 + $0x60] sm:$0xff]  ;;  %v63_v58 = vld [vmem:[%s2764_s2 + $0xf0] sm:$0xff] }
   0xe   :  { %1732 = vmatprep.subr.bf16.mxu0 %v1731_v20  ;;  %1756 = vmatprep.subr.bf16.mxu1 %v2116_v39  ;;  %v1743_v55 = vpack.c.bf16 %v62_v53, %v61_v52  ;;  %v46_v57 = vld [vmem:[%s2764_s2 + $0x68] sm:$0xff]  ;;  %v64_v59 = vld [vmem:[%s2764_s2 + $0xf8] sm:$0xff]  ;;  %v47_v62 = vld [vmem:[%s2764_s2 + $0x70] sm:$0xff] }
   0xf   :  { %v1745_v60 = vpack.c.bf16 %v46_v57, %v45_v56  ;;  %v1747_v61 = vpack.c.bf16 %v64_v59, %v63_v58  ;;  %v48_v63 = vld [vmem:[%s2764_s2 + $0x78] sm:$0xff]  ;;  %v161_v1 = vld [vmem:[%s2766_s4 + $0x60] sm:$0xff]  ;;  %v171_v5 = vld [vmem:[%s2766_s4 + $0xb0] sm:$0xff] }
  0x10   :  { %v1749_v0 = vpack.c.bf16 %v48_v63, %v47_v62  ;;  %v164_v2 = vld [vmem:[%s2766_s4 + $0x78] sm:$0xff]  ;;  %v167_v7 = vld [vmem:[%s2766_s4 + $0x90] sm:$0xff]  ;;  %v170_v8 = vld [vmem:[%s2766_s4 + $0xa8] sm:$0xff] }
  0x11   :  { %1734 = vmatpush3.bf16.msra.mxu0 %v1733_v32  ;;  %1758 = vmatpush1.bf16.msra.mxu1 %v2138_v46  ;;  %v2181_v3 = vpack.c.bf16 %v164_v2, %v161_v1  ;;  %v168_v4 = vld [vmem:[%s2766_s4 + $0x98] sm:$0xff]  ;;  %v2198_v9 = vpack.c.bf16 %v170_v8, %v167_v7  ;;  %v151_v15 = vld [vmem:[%s2766_s4 + $0x10] sm:$0xff]  ;;  %v154_v16 = vld [vmem:[%s2766_s4 + $0x28] sm:$0xff] }
  0x12   :  { %1736 = vmatprep.subr.bf16.mxu0 %v1735_v37  ;;  %1760 = vmatprep.subr.bf16.mxu1 %v2141_v48  ;;  %v2190_v6 = vpack.c.bf16 %v171_v5, %v168_v4  ;;  %v2233_v18 = vpack.c.bf16 %v154_v16, %v151_v15  ;;  %v157_v20 = vld [vmem:[%s2766_s4 + $0x40] sm:$0xff]  ;;  %v160_v21 = vld [vmem:[%s2766_s4 + $0x58] sm:$0xff]  ;;  %v163_v23 = vld [vmem:[%s2766_s4 + $0x70] sm:$0xff] }
  0x13   :  { %v2247_v22 = vpack.c.bf16 %v160_v21, %v157_v20  ;;  %v166_v24 = vld [vmem:[%s2766_s4 + $0x88] sm:$0xff]  ;;  %v169_v26 = vld [vmem:[%s2766_s4 + $0xa0] sm:$0xff]  ;;  %v172_v27 = vld [vmem:[%s2766_s4 + $0xb8] sm:$0xff] }
  0x14   :  { %v2269_v28 = vpack.c.bf16 %v172_v27, %v169_v26  ;;  %v338_v29 = vld [vmem:[%s2768_s5] sm:$0xff]  ;;  %v339_v30 = vld [vmem:[%s2768_s5 + $0x8] sm:$0xff]  ;;  %v749_v51 = vld [vmem:[%s2769_s3 + $0x90] sm:$0xff] }
  0x15   :  { %1738 = vmatpush3.bf16.msra.mxu0 %v1737_v47  ;;  %1762 = vmatpush1.bf16.msra.mxu1 %v2181_v3  ;;  %v2281_v31 = vpack.c.bf16 %v339_v30, %v338_v29  ;;  %v747_v32 = vld [vmem:[%s2769_s3 + $0x80] sm:$0xff]  ;;  %v748_v34 = vld [vmem:[%s2769_s3 + $0x88] sm:$0xff]  ;;  %v750_v52 = vld [vmem:[%s2769_s3 + $0x98] sm:$0xff] }
  0x16   :  { %1740 = vmatprep.subr.bf16.mxu0 %v1739_v49  ;;  %1764 = vmatprep.subr.bf16.mxu1 %v2190_v6  ;;  %v2290_v35 = vpack.c.bf16 %v748_v34, %v747_v32  ;;  %v731_v45 = vld [vmem:[%s2769_s3] sm:$0xff]  ;;  %v732_v47 = vld [vmem:[%s2769_s3 + $0x8] sm:$0xff]  ;;  %v2317_v58 = vpack.c.bf16 %v750_v52, %v749_v51  ;;  %v733_v59 = vld [vmem:[%s2769_s3 + $0x10] sm:$0xff] }
  0x17   :  { %v2305_v49 = vld.sshfl [vmem:[%s2770_s1] sm:$0x33 pattern:$0x76325410]  ;;  %v752_v62 = vld [vmem:[%s2769_s3 + $0xa8] sm:$0xff]  ;;  %v753_v4 = vld [vmem:[%s2769_s3 + $0xb0] sm:$0xff] }
  0x18   :  { %v771_v56 = vcombine.high %v2305_v49, %v2305_v49  ;;  %v735_v1 = vld [vmem:[%s2769_s3 + $0x20] sm:$0xff]  ;;  %v736_v2 = vld [vmem:[%s2769_s3 + $0x28] sm:$0xff]  ;;  %v754_v5 = vld [vmem:[%s2769_s3 + $0xb8] sm:$0xff] }
  0x19   :  { %1742 = vmatpush3.bf16.msra.mxu0 %v1741_v54  ;;  %1766 = vmatpush1.bf16.msra.mxu1 %v2198_v9  ;;  %v2355_v7 = vpack.c.bf16 %v736_v2, %v735_v1  ;;  %v2358_v8 = vpack.c.bf16 %v754_v5, %v753_v4  ;;  %v756_v15 = vld [vmem:[%s2769_s3 + $0xc8] sm:$0xff]  ;;  %v757_v21 = vld [vmem:[%s2769_s3 + $0xd0] sm:$0xff]  ;;  %v742_v29 = vld [vmem:[%s2769_s3 + $0x58] sm:$0xff] }
  0x1a   :  { %1744 = vmatprep.subr.bf16.mxu0 %v1743_v55  ;;  %1767 = vmatprep.subr.bf16.mxu1 %v1987_v11  ;;  %v2313_v55 = vpack.c.bf16 %v732_v47, %v731_v45  ;;  %v740_v20 = vld [vmem:[%s2769_s3 + $0x48] sm:$0xff]  ;;  %v741_v27 = vld [vmem:[%s2769_s3 + $0x50] sm:$0xff]  ;;  %v759_v30 = vld [vmem:[%s2769_s3 + $0xe0] sm:$0xff] }
  0x1b   :  { %v760_v32 = vld [vmem:[%s2769_s3 + $0xe8] sm:$0xff]  ;;  %v2409_v34 = vpack.c.bf16 %v742_v29, %v741_v27  ;;  %v745_v45 = vld [vmem:[%s2769_s3 + $0x70] sm:$0xff]  ;;  %v746_v47 = vld [vmem:[%s2769_s3 + $0x78] sm:$0xff] }
  0x1c   :  { %v430_v51 = vld [vmem:[%s2771_s6 + $0x8] sm:$0xff]  ;;  %v433_v52 = vld [vmem:[%s2771_s6 + $0x20] sm:$0xff]  ;;  %v431_v29 = vld [vmem:[%s2771_s6 + $0x10] sm:$0xff] }
  0x1d   :  { %1746 = vmatpush3.bf16.msra.mxu0 %v1745_v60  ;;  %v734_v60 = vld [vmem:[%s2769_s3 + $0x18] sm:$0xff]  ;;  %v442_v1 = vld [vmem:[%s2771_s6 + $0x68] sm:$0xff]  ;;  %v445_v2 = vld [vmem:[%s2771_s6 + $0x80] sm:$0xff] }
  0x1e   :  { %1748 = vmatprep.subr.bf16.mxu0 %v1747_v61  ;;  %v751_v61 = vld [vmem:[%s2769_s3 + $0xa0] sm:$0xff]  ;;  %v2337_v63 = vpack.c.bf16 %v734_v60, %v733_v59  ;;  %v2488_v5 = vpack.c.bf16 %v445_v2, %v442_v1  ;;  %v452_v2 = vld [vmem:[%s2771_s6 + $0xb8] sm:$0xff] }
  0x1f   :  { %v449_v1 = vld [vmem:[%s2771_s6 + $0xa0] sm:$0xff] }
  0x21   :  { %1750 = vmatpush3.bf16.msra.mxu0 %v1749_v0  ;;  %v2340_v0 = vpack.c.bf16 %v752_v62, %v751_v61  ;;  %v435_v61 = vld [vmem:[%s2771_s6 + $0x30] sm:$0xff]  ;;  %v438_v62 = vld [vmem:[%s2771_s6 + $0x48] sm:$0xff] }
  0x22   :  { %1779 = vmatprep.subr.bf16.mxu0 %v1987_v11  ;;  %v2485_v4 = vpack.c.bf16 %v438_v62, %v435_v61 }
  0x24   :  { %141 = vmatmul.mubr.f32.vlgmr.msra.gmra.mrb[0].mxu0 %v1427_v25  ;;  %v2259_v25 = vpack.c.bf16 %v166_v24, %v163_v23  ;;  %v758_v23 = vld [vmem:[%s2769_s3 + $0xd8] sm:$0xff] }
  0x25   :  { %1652 = vmatprep.mubr.msk.f32.mxu0 %vm1988_vm0, %v1986_v10  ;;  %1781 = vmatpush3.bf16.msra.mxu0 %v2281_v31  ;;  %v2394_v26 = vpack.c.bf16 %v758_v23, %v757_v21  ;;  %v447_v21 = vld [vmem:[%s2771_s6 + $0x90] sm:$0xff]  ;;  %v450_v23 = vld [vmem:[%s2771_s6 + $0xa8] sm:$0xff] }
  0x26   :  { %1843 = vmatprep.subr.bf16.mxu0 %v2290_v35  ;;  %v2515_v27 = vpack.c.bf16 %v450_v23, %v447_v21 }
  0xf7   :  { %v1479_v12 = vpop.f32.mrb[0].mxu0 }
  0xf8   :  { %v1480_v13 = vpop.f32.mrb[1].mxu0 }
  0xf9   :  { %v1481_v14 = vadd.f32 %v1480_v13, %v1479_v12  ;;  %v737_v12 = vld [vmem:[%s2769_s3 + $0x30] sm:$0xff]  ;;  %v738_v13 = vld [vmem:[%s2769_s3 + $0x38] sm:$0xff] }
  0xfa   :  { %v2373_v16 = vpack.c.bf16 %v738_v13, %v737_v12  ;;  %v441_v12 = vld [vmem:[%s2771_s6 + $0x60] sm:$0xff]  ;;  %v444_v13 = vld [vmem:[%s2771_s6 + $0x78] sm:$0xff] }
  0xfb   :  { %v143_v17 = vadd.f32 1.0, %v1481_v14  ;;  %v755_v14 = vld [vmem:[%s2769_s3 + $0xc0] sm:$0xff] }
  0xfd   :  { %v146_v19 = vmax.f32 %v143_v17, 0.0  ;;  %v2376_v17 = vpack.c.bf16 %v756_v15, %v755_v14  ;;  %v448_v14 = vld [vmem:[%s2771_s6 + $0x98] sm:$0xff]  ;;  %v451_v15 = vld [vmem:[%s2771_s6 + $0xb0] sm:$0xff] }
  0xff   :  { %1428 = vmatmul.mubr.msk.f32.vlgmr.msra.gmra.mrb[0].mxu1 %vm173_vm1, %v146_v19  ;;  %148 = vst.msk [vmem:[%s2767_s7] sm:$0x3] %vm147_vm2, %v146_v19 }
 0x100   :  { %1769 = vmatpush3.bf16.msra.mxu1 %v2233_v18  ;;  %1645 = vmatprep.mubr.msk.f32.mxu1 %vm1988_vm0, %v1986_v10 }
 0x101   :  { %1770 = vmatprep.subr.bf16.mxu1 %v1987_v11 }
 0x104   :  { %1772 = vmatpush3.bf16.msra.mxu1 %v2247_v22 }
 0x105   :  { %1773 = vmatprep.subr.bf16.mxu1 %v1987_v11 }
 0x108   :  { %1775 = vmatpush3.bf16.msra.mxu1 %v2259_v25 }
 0x109   :  { %1776 = vmatprep.subr.bf16.mxu1 %v1987_v11 }
 0x10c   :  { %1778 = vmatpush3.bf16.msra.mxu1 %v2269_v28 }
 0x10f   :  { %1646 = vmatmul.mubr.msk.f32.vlgmr.msra.gmra.mrb[2].mxu1 %vm173_vm1, %v146_v19  ;;  %v739_v19 = vld [vmem:[%s2769_s3 + $0x40] sm:$0xff] }
 0x110   :  { %521 = vmatprep.mubr.f32.mxu1 %v1986_v10  ;;  %v2391_v24 = vpack.c.bf16 %v740_v20, %v739_v19  ;;  %v2503_v19 = vpack.c.bf16 %v444_v13, %v441_v12  ;;  %v2506_v20 = vpack.c.bf16 %v451_v15, %v448_v14  ;;  %v1808_v14 = vpack.c.bf16 %v452_v2, %v449_v1  ;;  %v1340_v1 = vld [vmem:[%s2764_s2 + $0xa8] sm:$0xff] }
 0x1d2   :  { %v243_v36 = vpop.f32.mrb[0].mxu1 }
 0x1d3   :  { %v318_v37 = vadd.f32 1.0, %v243_v36  ;;  %v245_v40 = vpop.f32.mrb[1].mxu1  ;;  %v2412_v36 = vpack.c.bf16 %v760_v32, %v759_v30  ;;  %v434_v30 = vld [vmem:[%s2771_s6 + $0x28] sm:$0xff] }
 0x1d4   :  { %v319_v41 = vadd.f32 1.0, %v245_v40  ;;  %v744_v40 = vld [vmem:[%s2769_s3 + $0x68] sm:$0xff]  ;;  %v1799_v32 = vpack.c.bf16 %v434_v30, %v431_v29 }
 0x1d5   :  { %v320_v42 = vmax.f32 %v318_v37, 0.0  ;;  %v743_v37 = vld [vmem:[%s2769_s3 + $0x60] sm:$0xff] }
 0x1d6   :  { %v321_v43 = vmax.f32 %v319_v41, 0.0  ;;  %v761_v41 = vld [vmem:[%s2769_s3 + $0xf0] sm:$0xff] }
 0x1d8   :  { %v324_v44 = vcombine.low %v320_v42, %v321_v43  ;;  %v762_v42 = vld [vmem:[%s2769_s3 + $0xf8] sm:$0xff]  ;;  %v2427_v43 = vpack.c.bf16 %v744_v40, %v743_v37  ;;  %v437_v37 = vld [vmem:[%s2771_s6 + $0x40] sm:$0xff] }
 0x1d9   :  { %v440_v40 = vld [vmem:[%s2771_s6 + $0x58] sm:$0xff] }
 0x1da   :  { %1430 = vst.sshfl [vmem:[%s2767_s7 + $0xa] sm:$0x33 pattern:$0x76325410] %v324_v44  ;;  %v2430_v44 = vpack.c.bf16 %v762_v42, %v761_v41  ;;  %v1989_v41 = vmov 1983009808  }
 0x1db   :  { %v419_v42 = vunpack.c.l.s4 %v1989_v41 }
 0x1e2   :  { %v314_v50 = vpop.f32.mrb[2].mxu1 }
 0x1e3   :  { %v334_v53 = vadd.f32 1.0, %v314_v50  ;;  %v1647_v54 = vpop.f32.mrb[3].mxu1  ;;  %v2439_v50 = vpack.c.bf16 %v746_v47, %v745_v45  ;;  %v421_v45 = vlaneseq  ;;  %v1802_v47 = vpack.c.bf16 %v440_v40, %v437_v37 }
 0x1e4   :  { %v2456_v54 = vpack.c.bf16 %v433_v52, %v430_v51  ;;  %v443_v51 = vld [vmem:[%s2771_s6 + $0x70] sm:$0xff]  ;;  %v446_v52 = vld [vmem:[%s2771_s6 + $0x88] sm:$0xff] }
 0x1e5   :  { %v335_v57 = vmax.f32 %v334_v53, 0.0  ;;  %v429_v53 = vld [vmem:[%s2771_s6] sm:$0xff] }
 0x1e6   :  { %1783 = vmatprep.subr.bf16.mxu1 %v2456_v54 }
 0x1e7   :  { %1653 = vmatmul.mubr.msk.f32.vlgmr.msra.gmra.mrb[2].mxu0 %vm340_vm3, %v335_v57  ;;  %337 = vst.msk [vmem:[%s2767_s7 + $0x2] sm:$0x3] %vm336_vm4, %v335_v57  ;;  %v439_v57 = vld [vmem:[%s2771_s6 + $0x50] sm:$0xff] }
 0x1e8   :  { %1845 = vmatpush3.bf16.msra.mxu0 %v2313_v55  ;;  %838 = vmatprep.mubr.f32.mxu0 %v771_v56  ;;  %v436_v56 = vld [vmem:[%s2771_s6 + $0x38] sm:$0xff] }
 0x1e9   :  { %1847 = vmatprep.subr.bf16.mxu0 %v2317_v58  ;;  %v2469_v60 = vpack.c.bf16 %v439_v57, %v436_v56  ;;  %v1805_v56 = vpack.c.bf16 %v446_v52, %v443_v51  ;;  %v1337_v52 = vld [vmem:[%s2764_s2 + $0x90] sm:$0xff] }
 0x1ec   :  { %1849 = vmatpush3.bf16.msra.mxu0 %v2337_v63 }
 0x1ed   :  { %1851 = vmatprep.subr.bf16.mxu0 %v2340_v0 }
 0x1f0   :  { %1853 = vmatpush3.bf16.msra.mxu0 %v2355_v7 }
 0x1f1   :  { %1855 = vmatprep.subr.bf16.mxu0 %v2358_v8 }
 0x1f4   :  { %1857 = vmatpush3.bf16.msra.mxu0 %v2373_v16 }
 0x1f5   :  { %1859 = vmatprep.subr.bf16.mxu0 %v2376_v17 }
 0x1f8   :  { %1861 = vmatpush3.bf16.msra.mxu0 %v2391_v24 }
 0x1f9   :  { %1863 = vmatprep.subr.bf16.mxu0 %v2394_v26 }
 0x1fc   :  { %1865 = vmatpush3.bf16.msra.mxu0 %v2409_v34 }
 0x1fd   :  { %1867 = vmatprep.subr.bf16.mxu0 %v2412_v36 }
 0x200   :  { %1869 = vmatpush3.bf16.msra.mxu0 %v2427_v43 }
 0x201   :  { %1871 = vmatprep.subr.bf16.mxu0 %v2430_v44 }
 0x204   :  { %1873 = vmatpush3.bf16.msra.mxu0 %v2439_v50 }
 0x205   :  { %1890 = vmatprep.subr.bf16.mxu0 %v1987_v11 }
 0x207   :  { %839 = vmatmul.mubr.f32.vlgmr.msra.gmra.mrb[4].mxu0 %v2305_v49  ;;  %v432_v49 = vld [vmem:[%s2771_s6 + $0x18] sm:$0xff] }
 0x208   :  { %1690 = vmatprep.mubr.msk.f32.mxu0 %vm1988_vm0, %v1986_v10  ;;  %v2467_v59 = vpack.c.bf16 %v432_v49, %v429_v53  ;;  %1892 = vmatpush3.bf16.msra.mxu0 %v1799_v32  ;;  %v420_v53 = vunpack.c.0.s8 %v419_v42  ;;  %v422_v49 = vshrl.u32 %v421_v45, 7  ;;  %v1319_v45 = vld [vmem:[%s2764_s2] sm:$0xff] }
 0x209   :  { %1893 = vmatprep.subr.bf16.mxu0 %v1987_v11 }
 0x20a   :  { %1785 = vmatpush1.bf16.msra.mxu1 %v2467_v59  ;;  %v2547_v13 = vsub.s32 %v420_v53, %v422_v49  ;;  %v1338_v53 = vld [vmem:[%s2764_s2 + $0x98] sm:$0xff] }
 0x20b   :  { %1787 = vmatprep.subr.bf16.mxu1 %v2469_v60  ;;  %v1937_v49 = vpack.c.bf16 %v1338_v53, %v1337_v52 }
 0x20c   :  { %1895 = vmatpush3.bf16.msra.mxu0 %v1802_v47 }
 0x20d   :  { %1896 = vmatprep.subr.bf16.mxu0 %v1987_v11 }
 0x20e   :  { %1789 = vmatpush1.bf16.msra.mxu1 %v2485_v4 }
 0x20f   :  { %1791 = vmatprep.subr.bf16.mxu1 %v2488_v5 }
 0x210   :  { %1898 = vmatpush3.bf16.msra.mxu0 %v1805_v56 }
 0x211   :  { %1899 = vmatprep.subr.bf16.mxu0 %v1987_v11 }
 0x212   :  { %1793 = vmatpush1.bf16.msra.mxu1 %v2503_v19 }
 0x213   :  { %1795 = vmatprep.subr.bf16.mxu1 %v2506_v20 }
 0x214   :  { %1901 = vmatpush3.bf16.msra.mxu0 %v1808_v14 }
 0x215   :  { %1906 = vmatprep.subr.bf16.mxu0 %v2103_v33 }
 0x216   :  { %1797 = vmatpush1.bf16.msra.mxu1 %v2515_v27 }
 0x217   :  { %1798 = vmatprep.subr.bf16.mxu1 %v1987_v11 }
 0x2ba   :  { %v410_v57 = vpop.f32.mrb[2].mxu0 }
 0x2bb   :  { %v414_v61 = vadd.f32 1.0, %v410_v57  ;;  %v1654_v62 = vpop.f32.mrb[3].mxu0  ;;  %v1322_v57 = vld [vmem:[%s2764_s2 + $0x18] sm:$0xff] }
 0x2bc   :  { %v1339_v62 = vld [vmem:[%s2764_s2 + $0xa0] sm:$0xff] }
 0x2bd   :  { %v415_v12 = vmax.f32 %v414_v61, 0.0  ;;  %v1941_v2 = vpack.c.bf16 %v1340_v1, %v1339_v62 }
 0x2bf   :  { %416 = vst.msk [vmem:[%s2767_s7 + $0xe] sm:$0x3] %vm147_vm2, %v415_v12  ;;  %453 = vrot.lane.b32.xlu0 %v415_v12, %s1990_s20  ;;  %v424_v15 = vrot.slane %v415_v12, %v2547_v13  ;;  %v1323_v12 = vld [vmem:[%s2764_s2 + $0x20] sm:$0xff] }
 0x2c3   :  { %425 = vrot.lane.b32.xlu0 %v424_v15, %s1990_s20  ;;  %v1341_v15 = vld [vmem:[%s2764_s2 + $0xb0] sm:$0xff] }
 0x2da   :  { %v1570_v21 = vpop.f32.mrb[4].mxu0 }
 0x2db   :  { %v1571_v23 = vpop.f32.mrb[5].mxu0 }
 0x2dc   :  { %v1572_v29 = vadd.f32 %v1571_v23, %v1570_v21  ;;  %v1342_v21 = vld [vmem:[%s2764_s2 + $0xb8] sm:$0xff] }
 0x2dd   :  { %v1945_v23 = vpack.c.bf16 %v1342_v21, %v1341_v15 }
 0x2de   :  { %v841_v30 = vadd.f32 1.0, %v1572_v29  ;;  %v1325_v29 = vld [vmem:[%s2764_s2 + $0x30] sm:$0xff] }
 0x2e0   :  { %v2557_v37 = vmax.f32 %v841_v30, 0.0  ;;  %v1326_v30 = vld [vmem:[%s2764_s2 + $0x38] sm:$0xff] }
 0x2e2   :  { %845 = vst.msk [vmem:[%s2767_s7 + $0x1c] sm:$0x3] %vm147_vm2, %v2557_v37  ;;  %1691 = vmatmul.mubr.msk.f32.vlgmr.msra.gmra.mrb[6].mxu0 %vm173_vm1, %v2557_v37 }
 0x2e3   :  { %1908 = vmatpush1.bf16.msra.mxu0 %v2114_v38  ;;  %1213 = vmatprep.mubr.f32.mxu0 %v1986_v10 }
 0x2e4   :  { %1910 = vmatprep.subr.bf16.mxu0 %v2116_v39 }
 0x2e7   :  { %1912 = vmatpush1.bf16.msra.mxu0 %v2138_v46 }
 0x2e8   :  { %1914 = vmatprep.subr.bf16.mxu0 %v2141_v48 }
 0x2eb   :  { %1916 = vmatpush1.bf16.msra.mxu0 %v2181_v3 }
 0x2ec   :  { %1918 = vmatprep.subr.bf16.mxu0 %v2190_v6 }
 0x2ef   :  { %1920 = vmatpush1.bf16.msra.mxu0 %v2198_v9 }
 0x331   :  { %v454_v33 = vpop.permute.xlu0 %453 }
 0x332   :  { %1432 = vmatmul.mubr.msk.f32.vlgmr.msra.gmra.mrb[4].mxu1 %vm173_vm1, %v454_v33 }
 0x333   :  { %1800 = vmatpush3.bf16.msra.mxu1 %v1799_v32  ;;  %1671 = vmatprep.mubr.msk.f32.mxu1 %vm1988_vm0, %v1986_v10 }
 0x334   :  { %1801 = vmatprep.subr.bf16.mxu1 %v1987_v11 }
 0x335   :  { %v426_v38 = vpop.permute.xlu0 %425 }
 0x336   :  { %428 = vst.msk [vmem:[%s2767_s7 + $0x4] sm:$0x3] %vm147_vm2, %v426_v38  ;;  %v1344_v38 = vld [vmem:[%s2764_s2 + $0xc8] sm:$0xff] }
 0x337   :  { %1803 = vmatpush3.bf16.msra.mxu1 %v1802_v47  ;;  %v1320_v47 = vld [vmem:[%s2764_s2 + $0x8] sm:$0xff] }
 0x338   :  { %1804 = vmatprep.subr.bf16.mxu1 %v1987_v11  ;;  %v1935_v51 = vpack.c.bf16 %v1320_v47, %v1319_v45 }
 0x33b   :  { %1806 = vmatpush3.bf16.msra.mxu1 %v1805_v56  ;;  %v1321_v56 = vld [vmem:[%s2764_s2 + $0x10] sm:$0xff] }
 0x33c   :  { %1807 = vmatprep.subr.bf16.mxu1 %v1987_v11  ;;  %v1939_v61 = vpack.c.bf16 %v1322_v57, %v1321_v56 }
 0x33f   :  { %1809 = vmatpush3.bf16.msra.mxu1 %v1808_v14 }
 0x340   :  { %1811 = vmatprep.subr.bf16.mxu1 %v2290_v35 }
 0x342   :  { %1672 = vmatmul.mubr.msk.f32.vlgmr.msra.gmra.mrb[6].mxu1 %vm173_vm1, %v454_v33  ;;  %v1343_v33 = vld [vmem:[%s2764_s2 + $0xc0] sm:$0xff] }
 0x343   :  { %1813 = vmatpush3.bf16.msra.mxu1 %v2313_v55 }
 0x344   :  { %1815 = vmatprep.subr.bf16.mxu1 %v2317_v58 }
 0x347   :  { %1817 = vmatpush3.bf16.msra.mxu1 %v2337_v63 }
 0x348   :  { %1819 = vmatprep.subr.bf16.mxu1 %v2340_v0 }
 0x34b   :  { %1821 = vmatpush3.bf16.msra.mxu1 %v2355_v7 }
 0x34c   :  { %1823 = vmatprep.subr.bf16.mxu1 %v2358_v8 }
 0x34f   :  { %1825 = vmatpush3.bf16.msra.mxu1 %v2373_v16 }
 0x350   :  { %1827 = vmatprep.subr.bf16.mxu1 %v2376_v17 }
 0x353   :  { %1829 = vmatpush3.bf16.msra.mxu1 %v2391_v24 }
 0x354   :  { %1831 = vmatprep.subr.bf16.mxu1 %v2394_v26 }
 0x357   :  { %1833 = vmatpush3.bf16.msra.mxu1 %v2409_v34 }
 0x358   :  { %1835 = vmatprep.subr.bf16.mxu1 %v2412_v36 }
 0x35b   :  { %1837 = vmatpush3.bf16.msra.mxu1 %v2427_v43 }
 0x35c   :  { %1839 = vmatprep.subr.bf16.mxu1 %v2430_v44 }
 0x35f   :  { %1841 = vmatpush3.bf16.msra.mxu1 %v2439_v50 }
 0x360   :  { %1875 = vmatprep.subr.bf16.mxu1 %v2456_v54 }
 0x3b5   :  { %v1010_v39 = vpop.f32.mrb[6].mxu0 }
 0x3b6   :  { %v1030_v46 = vadd.f32 1.0, %v1010_v39  ;;  %v1692_v48 = vpop.f32.mrb[7].mxu0  ;;  %v1949_v39 = vpack.c.bf16 %v1344_v38, %v1343_v33 }
 0x3b7   :  { %v1328_v48 = vld [vmem:[%s2764_s2 + $0x48] sm:$0xff] }
 0x3b8   :  { %v1031_v3 = vmax.f32 %v1030_v46, 0.0  ;;  %v1327_v46 = vld [vmem:[%s2764_s2 + $0x40] sm:$0xff] }
 0x3ba   :  { %1032 = vst.msk [vmem:[%s2767_s7 + $0x1a] sm:$0x3] %vm336_vm4, %v1031_v3 }
 0x405   :  { %v523_v6 = vpop.f32.mrb[4].mxu1 }
 0x406   :  { %v598_v9 = vadd.f32 1.0, %v523_v6  ;;  %v525_v35 = vpop.f32.mrb[5].mxu1  ;;  %v1345_v6 = vld [vmem:[%s2764_s2 + $0xd0] sm:$0xff] }
 0x407   :  { %v599_v55 = vadd.f32 1.0, %v525_v35 }
 0x408   :  { %v1434_v58 = vmul.f32 -1.442695, %v598_v9  ;;  %v1346_v9 = vld [vmem:[%s2764_s2 + $0xd8] sm:$0xff] }
 0x409   :  { %v1435_v63 = vmul.f32 -1.442695, %v599_v55  ;;  %v1953_v35 = vpack.c.bf16 %v1346_v9, %v1345_v6  ;;  %v1329_v55 = vld [vmem:[%s2764_s2 + $0x50] sm:$0xff] }
 0x40a   :  { %1970 = vpow2.f32 %v1434_v58  ;;  %v1330_v58 = vld [vmem:[%s2764_s2 + $0x58] sm:$0xff] }
 0x40b   :  { %1972 = vpow2.f32 %v1435_v63  ;;  %v1955_v63 = vpack.c.bf16 %v1330_v58, %v1329_v55 }
 0x414   :  { %v1971_v0 = vpop.eup %1970 }
 0x415   :  { %v1973_v7 = vpop.eup %1972  ;;  %v606_v8 = vadd.f32 1.0, %v1971_v0  ;;  %v594_v16 = vpop.f32.mrb[6].mxu1  ;;  %v1347_v0 = vld [vmem:[%s2764_s2 + $0xe0] sm:$0xff] }
 0x416   :  { %v607_v17 = vadd.f32 1.0, %v1973_v7  ;;  %v624_v24 = vadd.f32 1.0, %v594_v16  ;;  %v1673_v26 = vpop.f32.mrb[7].mxu1  ;;  %v1348_v7 = vld [vmem:[%s2764_s2 + $0xe8] sm:$0xff]  ;;  %v1331_v16 = vld [vmem:[%s2764_s2 + $0x60] sm:$0xff] }
 0x417   :  { %1974 = vrcp.f32 %v606_v8  ;;  %v1957_v8 = vpack.c.bf16 %v1348_v7, %v1347_v0  ;;  %v1349_v26 = vld [vmem:[%s2764_s2 + $0xf0] sm:$0xff] }
 0x418   :  { %1976 = vrcp.f32 %v607_v17  ;;  %v625_v34 = vmax.f32 %v624_v24, 0.0  ;;  %v1332_v17 = vld [vmem:[%s2764_s2 + $0x68] sm:$0xff] }
 0x419   :  { %v1959_v24 = vpack.c.bf16 %v1332_v17, %v1331_v16 }
 0x41a   :  { %626 = vst.msk [vmem:[%s2767_s7 + $0x10] sm:$0x3] %vm336_vm4, %v625_v34  ;;  %v1350_v34 = vld [vmem:[%s2764_s2 + $0xf8] sm:$0xff] }
 0x421   :  { %v1975_v36 = vpop.eup %1974 }
 0x422   :  { %v1977_v43 = vpop.eup %1976 }
 0x423   :  { %v614_v44 = vcombine.low %v1975_v36, %v1977_v43  ;;  %723 = vmatprep.mubr.f32.mxu1 %v1977_v43  ;;  %v1333_v43 = vld [vmem:[%s2764_s2 + $0x70] sm:$0xff] }
 0x424   :  { %724 = vmatmul.mubr.f32.vlgmr.msra.gmra.mrb[8].mxu1 %v1975_v36  ;;  %v1961_v36 = vpack.c.bf16 %v1350_v34, %v1349_v26 }
 0x425   :  { %1436 = vst.sshfl [vmem:[%s2767_s7 + $0x6] sm:$0x33 pattern:$0x76325410] %v614_v44  ;;  %1877 = vmatpush1.bf16.msra.mxu1 %v2467_v59  ;;  %937 = vmatprep.mubr.f32.mxu1 %v1986_v10  ;;  %v1334_v44 = vld [vmem:[%s2764_s2 + $0x78] sm:$0xff] }
 0x426   :  { %1879 = vmatprep.subr.bf16.mxu1 %v2469_v60 }
 0x429   :  { %1881 = vmatpush1.bf16.msra.mxu1 %v2485_v4 }
 0x42a   :  { %1883 = vmatprep.subr.bf16.mxu1 %v2488_v5 }
 0x42d   :  { %1885 = vmatpush1.bf16.msra.mxu1 %v2503_v19 }
 0x42e   :  { %1887 = vmatprep.subr.bf16.mxu1 %v2506_v20 }
 0x431   :  { %1889 = vmatpush1.bf16.msra.mxu1 %v2515_v27 }
 0x432   :  { %1902 = vmatprep.subr.bf16.mxu1 %v1987_v11 }
 0x434   :  { %1438 = vmatmul.mubr.msk.f32.vlgmr.msra.gmra.mrb[10].mxu1 %vm173_vm1, %v2557_v37  ;;  %v1947_v37 = vpack.c.bf16 %v1326_v30, %v1325_v29 }
 0x435   :  { %1904 = vmatpush3.bf16.msra.mxu1 %v2281_v31  ;;  %1697 = vmatprep.mubr.msk.f32.mxu1 %vm1988_vm0, %v1986_v10 }
 0x436   :  { %1921 = vmatprep.subr.bf16.mxu1 %v1987_v11 }
 0x438   :  { %1698 = vmatmul.mubr.msk.f32.vlgmr.msra.gmra.mrb[12].mxu1 %vm340_vm3, %v1031_v3  ;;  %v1951_v3 = vpack.c.bf16 %v1328_v48, %v1327_v46 }
 0x439   :  { %1923 = vmatpush3.bf16.msra.mxu1 %v2233_v18  ;;  %1716 = vmatprep.mubr.msk.f32.mxu1 %vm1988_vm0, %v1986_v10  ;;  %v1335_v10 = vld [vmem:[%s2764_s2 + $0x80] sm:$0xff] }
 0x43a   :  { %1924 = vmatprep.subr.bf16.mxu1 %v1987_v11 }
 0x43d   :  { %1926 = vmatpush3.bf16.msra.mxu1 %v2247_v22 }
 0x43e   :  { %1927 = vmatprep.subr.bf16.mxu1 %v1987_v11 }
 0x441   :  { %1929 = vmatpush3.bf16.msra.mxu1 %v2259_v25 }
 0x442   :  { %1930 = vmatprep.subr.bf16.mxu1 %v1987_v11  ;;  %v1336_v11 = vld [vmem:[%s2764_s2 + $0x88] sm:$0xff] }
 0x443   :  { %v1933_v22 = vpack.c.bf16 %v1336_v11, %v1335_v10 }
 0x445   :  { %1932 = vmatpush3.bf16.msra.mxu1 %v2269_v28  ;;  %1934 = vmatprep.subr.bf16.mxu0 %v1933_v22 }
 0x4f7   :  { %v1535_v31 = vpop.f32.mrb[8].mxu1 }
 0x4f8   :  { %v1536_v50 = vpop.f32.mrb[9].mxu1 }
 0x4f9   :  { %v1537_v54 = vadd.f32 %v1536_v50, %v1535_v31  ;;  %v1963_v31 = vpack.c.bf16 %v1334_v44, %v1333_v43 }
 0x4fb   :  { %v726_v59 = vadd.f32 1.0, %v1537_v54 }
 0x4fd   :  { %v729_v18 = vmax.f32 %v726_v59, 0.0 }
 0x4ff   :  { %730 = vst.msk [vmem:[%s2767_s7 + $0x12] sm:$0x3] %vm147_vm2, %v729_v18 }
 0x507   :  { %v939_v25 = vpop.f32.mrb[10].mxu1 }
 0x508   :  { %v1014_v28 = vadd.f32 1.0, %v939_v25  ;;  %v941_v60 = vpop.f32.mrb[11].mxu1 }
 0x509   :  { %v1015_v4 = vadd.f32 1.0, %v941_v60 }
 0x50a   :  { %v1016_v5 = vmax.f32 %v1014_v28, 0.0 }
 0x50b   :  { %v1017_v19 = vmax.f32 %v1015_v4, 0.0  ;;  %v1104_v20 = vpop.f32.mrb[12].mxu1 }
 0x50c   :  { %v1108_v27 = vadd.f32 1.0, %v1104_v20  ;;  %v1699_v32 = vpop.f32.mrb[13].mxu1 }
 0x50d   :  { %v1020_v40 = vcombine.low %v1016_v5, %v1017_v19 }
 0x50e   :  { %v1109_v41 = vmax.f32 %v1108_v27, 0.0 }
 0x50f   :  { %1440 = vst.sshfl [vmem:[%s2767_s7 + $0x24] sm:$0x33 pattern:$0x76325410] %v1020_v40 }
 0x510   :  { %1110 = vst.msk [vmem:[%s2767_s7 + $0x18] sm:$0x3] %vm147_vm2, %v1109_v41  ;;  %1442 = vmatmul.mubr.msk.f32.vlgmr.msra.gmra.mrb[8].mxu0 %vm173_vm1, %v1109_v41  ;;  %1717 = vmatmul.mubr.msk.f32.vlgmr.msra.gmra.mrb[14].mxu1 %vm173_vm1, %v1109_v41  ;;  %v1118_v42 = vrot.slane %v1109_v41, %v2547_v13  ;;  %v1324_v13 = vld [vmem:[%s2764_s2 + $0x28] sm:$0xff] }
 0x511   :  { %1936 = vmatpush3.bf16.msra.mxu0 %v1935_v51  ;;  %v1943_v14 = vpack.c.bf16 %v1324_v13, %v1323_v12 }
 0x512   :  { %1119 = vrot.lane.b32.xlu1 %v1118_v42, %s1990_s20  ;;  %1938 = vmatprep.subr.bf16.mxu0 %v1937_v49 }
 0x515   :  { %1940 = vmatpush3.bf16.msra.mxu0 %v1939_v61 }
 0x516   :  { %1942 = vmatprep.subr.bf16.mxu0 %v1941_v2 }
 0x519   :  { %1944 = vmatpush3.bf16.msra.mxu0 %v1943_v14 }
 0x51a   :  { %1946 = vmatprep.subr.bf16.mxu0 %v1945_v23 }
 0x51d   :  { %1948 = vmatpush3.bf16.msra.mxu0 %v1947_v37 }
 0x51e   :  { %1950 = vmatprep.subr.bf16.mxu0 %v1949_v39 }
 0x521   :  { %1952 = vmatpush3.bf16.msra.mxu0 %v1951_v3 }
 0x522   :  { %1954 = vmatprep.subr.bf16.mxu0 %v1953_v35 }
 0x525   :  { %1956 = vmatpush3.bf16.msra.mxu0 %v1955_v63 }
 0x526   :  { %1958 = vmatprep.subr.bf16.mxu0 %v1957_v8 }
 0x529   :  { %1960 = vmatpush3.bf16.msra.mxu0 %v1959_v24 }
 0x52a   :  { %1962 = vmatprep.subr.bf16.mxu0 %v1961_v36 }
 0x52d   :  { %1964 = vmatpush3.bf16.msra.mxu0 %v1963_v31 }
 0x584   :  { %v1120_v50 = vpop.permute.xlu1 %1119 }
 0x585   :  { %1122 = vst.msk [vmem:[%s2767_s7 + $0x22] sm:$0x3] %vm147_vm2, %v1120_v50 }
 0x5e3   :  { %v1215_v54 = vpop.f32.mrb[8].mxu0  ;;  %v1286_v59 = vpop.f32.mrb[14].mxu1 }
 0x5e4   :  { %v1290_v18 = vadd.f32 1.0, %v1215_v54  ;;  %v1316_v10 = vadd.f32 1.0, %v1286_v59  ;;  %v1217_v11 = vpop.f32.mrb[9].mxu0  ;;  %v1718_v22 = vpop.f32.mrb[15].mxu1 }
 0x5e5   :  { %v1291_v25 = vadd.f32 1.0, %v1217_v11 }
 0x5e6   :  { %v1444_v28 = vmul.f32 -1.442695, %v1290_v18  ;;  %v1317_v60 = vmax.f32 %v1316_v10, 0.0 }
 0x5e7   :  { %v1445_v4 = vmul.f32 -1.442695, %v1291_v25 }
 0x5e8   :  { %1978 = vpow2.f32 %v1444_v28  ;;  %1318 = vst.msk [vmem:[%s2767_s7 + $0x20] sm:$0x3] %vm336_vm4, %v1317_v60 }
 0x5e9   :  { %1980 = vpow2.f32 %v1445_v4 }
 0x5f2   :  { %v1979_v5 = vpop.eup %1978 }
 0x5f3   :  { %v1981_v19 = vpop.eup %1980  ;;  %v1298_v20 = vadd.f32 1.0, %v1979_v5 }
 0x5f4   :  { %v1299_v27 = vadd.f32 1.0, %v1981_v19 }
 0x5f5   :  { %1982 = vrcp.f32 %v1298_v20 }
 0x5f6   :  { %1984 = vrcp.f32 %v1299_v27 }
 0x5ff   :  { %v1983_v32 = vpop.eup %1982 }
 0x600   :  { %v1985_v40 = vpop.eup %1984 }
 0x601   :  { %v1306_v41 = vcombine.low %v1983_v32, %v1985_v40  ;;  %1415 = vmatprep.mubr.f32.mxu0 %v1985_v40 }
 0x602   :  { %1416 = vmatmul.mubr.f32.vlgmr.msra.gmra.mrb[10].mxu0 %v1983_v32 }
 0x603   :  { %1446 = vst.sshfl [vmem:[%s2767_s7 + $0x14] sm:$0x33 pattern:$0x76325410] %v1306_v41 }
 0x6d5   :  { %v1626_v42 = vpop.f32.mrb[10].mxu0 }
 0x6d6   :  { %v1627_v45 = vpop.f32.mrb[11].mxu0 }
 0x6d7   :  { %v1628_v47 = vadd.f32 %v1627_v45, %v1626_v42 }
 0x6d9   :  { %v1418_v51 = vadd.f32 1.0, %v1628_v47 }
 0x6db   :  { %v1421_v52 = vmax.f32 %v1418_v51, 0.0 }
 0x6dd   :  { %1422 = vst.msk [vmem:[%s2767_s7 + $0x1e] sm:$0x3] %vm147_vm2, %v1421_v52 }

</bundles_post_ra>
